<compile_context>
chip_gen: v7x
topology: tpu7x:2x2x1
jax: 0.10.0
libtpu: 0.0.40
codegen_flags: <defaults>
</compile_context>

<pallas_src>
import functools
import math

import jax
import jax.numpy as jnp
from jax.experimental import pallas as pl
from jax.experimental.pallas import tpu as pltpu


def _round_up(v, m):
    return ((v + m - 1) // m) * m


def _add_pe_kernel(x_ref, pe_ref, o_ref, *, bc):
    # x_ref : (TS, bc*d_model)  lane-dense block of x
    # pe_ref: (TS, d_model)     positional-encoding rows for this tile
    # o_ref : (TS, bc*d_model)  lane-dense output block
    pe_blk = pe_ref[...]
    if bc > 1:
        # Broadcast pe across the B*C groups along the lane axis (done once
        # per grid step, on a small block -> negligible vs. HBM traffic).
        pe_blk = jnp.concatenate([pe_blk] * bc, axis=-1)
    o_ref[...] = x_ref[...] + pe_blk


def make_positional_encoding(d_model, max_len=5000, dtype=jnp.float32):
    """Deterministically build the pe buffer exactly like the nn.Module __init__."""
    assert d_model % 2 == 0, "d_model (= h*w) must be even for sin/cos interleave"
    position = jnp.arange(0, max_len, dtype=jnp.float32)[:, None]            # (max_len, 1)
    div_term = jnp.exp(jnp.arange(0, d_model, 2, dtype=jnp.float32)
                       * (-math.log(10000.0) / d_model))                     # (d_model//2,)
    ang = position * div_term                                                # (max_len, d_model//2)
    pe = jnp.stack([jnp.sin(ang), jnp.cos(ang)], axis=-1)                    # (max_len, d/2, 2)
    pe = pe.reshape(max_len, d_model)                                        # interleave sin/cos
    return pe.astype(dtype)                                                  # (max_len, d_model)


def _choose_seq_tile(S, row_bytes, target_bytes=4 * 1024 * 1024):
    """Rows of x per block: ~4 MiB per x block, multiple of 8 (sublane)."""
    ts = max(8, (target_bytes // max(row_bytes, 1)) // 8 * 8)
    if ts >= S:
        if S > 8:
            # Whole sequence fits in one block; still split into >=2 blocks so
            # both v7x TensorCores get work (near-zero cost on v5e/v6e).
            ts = min(S, _round_up((S + 1) // 2, 8))
        else:
            ts = S
    return ts


def positional_encoding_forward(x, pe, h, w):
    """x: (S, B, C, h, w); pe: (max_len, d_model) with d_model == h*w."""
    S, B, C, H, W = x.shape
    assert H == h and W == w
    d_model = h * w
    assert pe.shape[1] == d_model and pe.shape[0] >= S

    bc = B * C
    lane_width = bc * d_model

    # Glue reshapes / dtype alignment in plain JAX (free; XLA handles them).
    x_flat = x.reshape(S, lane_width)                 # lane-dense layout
    pe_slice = pe[:S].astype(x.dtype)                 # (S, d_model), match x dtype

    row_bytes = lane_width * x.dtype.itemsize
    ts = _choose_seq_tile(S, row_bytes)
    grid = (pl.cdiv(S, ts),)

    kernel = functools.partial(_add_pe_kernel, bc=bc)

    out_flat = pl.pallas_call(
        kernel,
        out_shape=jax.ShapeDtypeStruct((S, lane_width), x.dtype),
        grid_spec=pltpu.PrefetchScalarGridSpec(
            num_scalar_prefetch=0,
            grid=grid,
            in_specs=[
                pl.BlockSpec((ts, lane_width), lambda i: (i, 0)),
                pl.BlockSpec((ts, d_model), lambda i: (i, 0)),
            ],
            out_specs=pl.BlockSpec((ts, lane_width), lambda i: (i, 0)),
        ),
        compiler_params=pltpu.CompilerParams(
            dimension_semantics=("parallel",),
            # Double-buffered x-in + out (+ tiny pe) at ~4 MiB/block stays well
            # under v7x's 64 MiB physical VMEM; bump past v5e's 16 MiB scoped default.
            vmem_limit_bytes=48 * 1024 * 1024,
        ),
    )(x_flat, pe_slice)

    return out_flat.reshape(S, B, C, h, w)


if __name__ == "__main__":
    # Small shapes consistent with the module: d_model = h*w.
    S, B, C, h, w = 8, 2, 4, 4, 8
    d_model = h * w
    max_len = 64

    key = jax.random.PRNGKey(0)
    x = jax.random.normal(key, (S, B, C, h, w), dtype=jnp.float32)

    pe = make_positional_encoding(d_model, max_len=max_len)

    out = positional_encoding_forward(x, pe, h, w)
    out = jax.block_until_ready(out)

    # Pure-JAX reference check of the broadcast-add semantics.
    ref = x + pe[:S].reshape(S, 1, 1, h, w)
    assert out.shape == x.shape
    assert jnp.allclose(out, ref, atol=1e-6), "mismatch vs reference"

    print("KERNEL_OK")
</pallas_src>

<mosaic_0001>
module attributes {stable_mosaic.version = 11 : i64} {
  func.func @_add_pe_kernel(%arg0: i32, %arg1: memref<8x256xf32, #tpu.memory_space<vmem>>, %arg2: memref<8x32xf32, #tpu.memory_space<vmem>>, %arg3: memref<8x256xf32, #tpu.memory_space<vmem>>) attributes {dimension_semantics = [#tpu.dimension_semantics<parallel>], iteration_bounds = array<i64: 1>, scalar_prefetch = 0 : i64, scratch_operands = 0 : i64, tpu.core_type = #tpu.core_type<tc>, window_params = [{transform_indices = @transform_0, window_bounds = array<i64: 8, 256>}, {transform_indices = @transform_1, window_bounds = array<i64: 8, 32>}, {transform_indices = @transform_2, window_bounds = array<i64: 8, 256>}]} {
    %c0 = arith.constant 0 : index
    %c0_0 = arith.constant 0 : index
    %0 = vector.load %arg2[%c0, %c0_0] : memref<8x32xf32, #tpu.memory_space<vmem>>, vector<8x32xf32>
    %1 = tpu.concatenate %0, %0, %0, %0, %0, %0, %0, %0 in 1 : vector<8x32xf32>, vector<8x32xf32>, vector<8x32xf32>, vector<8x32xf32>, vector<8x32xf32>, vector<8x32xf32>, vector<8x32xf32>, vector<8x32xf32> -> vector<8x256xf32>
    %c0_1 = arith.constant 0 : index
    %c0_2 = arith.constant 0 : index
    %2 = vector.load %arg1[%c0_1, %c0_2] : memref<8x256xf32, #tpu.memory_space<vmem>>, vector<8x256xf32>
    %3 = arith.addf %2, %1 : vector<8x256xf32>
    %c0_3 = arith.constant 0 : index
    %c0_4 = arith.constant 0 : index
    %4 = vector.load %arg3[%c0_3, %c0_4] : memref<8x256xf32, #tpu.memory_space<vmem>>, vector<8x256xf32>
    tpu.vector_store %arg3[%c0_3, %c0_4], %3 {strides = array<i32>} : memref<8x256xf32, #tpu.memory_space<vmem>>, vector<8x256xf32>,
    return
  }
  func.func @transform_0(%arg0: i32) -> (i32, i32) {
    %c0_i32 = arith.constant 0 : i32
    %c0_i32_0 = arith.constant 0 : i32
    return %arg0, %c0_i32 : i32, i32
  }
  func.func @transform_1(%arg0: i32) -> (i32, i32) {
    %c0_i32 = arith.constant 0 : i32
    %c0_i32_0 = arith.constant 0 : i32
    return %arg0, %c0_i32 : i32, i32
  }
  func.func @transform_2(%arg0: i32) -> (i32, i32) {
    %c0_i32 = arith.constant 0 : i32
    %c0_i32_0 = arith.constant 0 : i32
    return %arg0, %c0_i32 : i32, i32
  }
}

</mosaic_0001>

<bundles_post_ra>
// kernel: tpu_custom_call.1
= control target key start
LH: loop header
LB: loop body
LE: loop exit
PB: predicated region body
PF: predicated region fallthrough
CT: control target
= control target key end

     0   :  { %7 = vsyncpa [#allocation3], 0  ;;  %s210_s0 = inlined_call_operand.hbm [shape: f32[8,256], index: 0, kind: input, shape index: {}]   ;;  %s211_s1 = inlined_call_operand.hbm [shape: f32[8,32], index: 1, kind: input, shape index: {}]   ;;  %s212_s2 = inlined_call_operand.hbm [shape: f32[8,256], index: 2, kind: output, shape index: {}]  }
   0x1   :  { %8 = vsyncpa [#allocation6], 0 }
   0x2   :  { %9 = vsyncpa [#allocation4], 0  ;;  %s153_s9 = smov [#allocation2]   ;;  %s154_s11 = smov [#allocation5]  }
   0x3   :  { %s16_s10 = sshll.u32 %s153_s9, 4  ;;  %s26_s12 = sshll.u32 %s154_s11, 4  ;;  %s17_s10 = int_to_ptr.vmem [resolvable:$true] %s16_s10  ;;  %s27_s12 = int_to_ptr.vmem [resolvable:$true] %s26_s12 }
   0x4   :  { %s81_s15 = scalar_lea.hbm %s210_s0, 256 }
   0x5   :  { %p82_p0 = scmp.ne.s32.totalorder %s210_s0, %s81_s15  ;;  %p85_p1 = scmp.lt.u32.totalorder %s81_s15, %s210_s0 }
   0x7   :  { %p87_p2 = pnand %p85_p1, %p82_p0 }
   0x9   :  { %90 = shalt.err (!%p87_p2)
}
   0xa   :  { %s91_s20 = scalar_lea.vmem %s17_s10, 256  ;;  %p96_p4 = scmp.lt.s32.totalorder %s17_s10, %s17_s10 }
   0xb   :  { %p92_p3 = scmp.ne.s32.totalorder %s17_s10, %s91_s20  ;;  %p97_p5 = scmp.lt.s32.totalorder %s91_s20, %s91_s20 }
   0xd   :  { %p98_p6 = por %p97_p5, %p96_p4 }
   0xf   :  { %p99_p7 = pnand %p98_p6, %p92_p3 }
  0x11   :  { %102 = shalt.err (!%p99_p7)
}
  0x12   :  { %19 = dma.hbm_to_vmem [thread:$0]  %s210_s0, 256, %s17_s10, [#allocation3]  }
  0x13   :  { %s103_s25 = scalar_lea.hbm %s211_s1, 128 }
  0x14   :  { %p104_p8 = scmp.ne.s32.totalorder %s211_s1, %s103_s25  ;;  %p107_p9 = scmp.lt.u32.totalorder %s103_s25, %s211_s1 }
  0x16   :  { %p109_p10 = pnand %p107_p9, %p104_p8 }
  0x18   :  { %112 = shalt.err (!%p109_p10)
}
  0x19   :  { %s113_s30 = scalar_lea.vmem %s27_s12, 128  ;;  %p118_p12 = scmp.lt.s32.totalorder %s27_s12, %s27_s12 }
  0x1a   :  { %p114_p11 = scmp.ne.s32.totalorder %s27_s12, %s113_s30  ;;  %p119_p13 = scmp.lt.s32.totalorder %s113_s30, %s113_s30 }
  0x1c   :  { %p120_p0 = por %p119_p13, %p118_p12 }
  0x1e   :  { %p121_p1 = pnand %p120_p0, %p114_p11 }
  0x20   :  { %124 = shalt.err (!%p121_p1)
}
  0x21   :  { %29 = dma.hbm_to_vmem [thread:$0]  %s211_s1, 128, %s27_s12, [#allocation6]  }
  0x22   :  { %147 = dma.done.wait [#allocation3], 256  }
  0x23   :  { %148 = vsyncadd [#allocation3], 4294967040 }
  0x24   :  { %149 = dma.done.wait [#allocation6], 128  }
  0x25   :  { %150 = vsyncadd [#allocation6], 4294967168  ;;  %v36_v0 = vld [vmem:[#allocation5] sm:$0xff]  ;;  %s155_s4 = smov 32   ;;  %s156_s5 = smov 96   ;;  %vm47_vm0 = vcmask 261120  }
  0x26   :  { %38 = vrot.lane.b32.xlu0 %v36_v0, %s155_s4  ;;  %44 = vrot.lane.b32.xlu1 %v36_v0, %s156_s5  ;;  %s157_s6 = smov 64   ;;  %vm49_vm1 = vcmask 523264   ;;  %vm51_vm2 = vcmask 785408   ;;  %v53_v5 = vld [vmem:[#allocation2] sm:$0xff]  ;;  %v54_v6 = vld [vmem:[#allocation2 + $0x8] sm:$0xff]  ;;  %s158_s1 = smov [#allocation7]  }
  0x27   :  { %s65_s7 = sshll.u32 %s158_s1, 4  ;;  %s66_s7 = int_to_ptr.vmem [resolvable:$true] %s65_s7 }
  0x28   :  { %s125_s8 = scalar_lea.vmem %s66_s7, 256  ;;  %p130_p3 = scmp.lt.s32.totalorder %s66_s7, %s66_s7 }
  0x29   :  { %p126_p2 = scmp.ne.s32.totalorder %s66_s7, %s125_s8  ;;  %p131_p4 = scmp.lt.s32.totalorder %s125_s8, %s125_s8 }
  0x2a   :  { %41 = vrot.lane.b32.xlu0 %v36_v0, %s157_s6 }
  0x2b   :  { %p132_p5 = por %p131_p4, %p130_p3 }
  0x2d   :  { %p133_p6 = pnand %p132_p5, %p126_p2 }
  0x98   :  { %v39_v1 = vpop.permute.xlu0 %38  ;;  %v45_v2 = vpop.permute.xlu1 %44 }
  0x99   :  { %v48_v3 = vsel %vm47_vm0, %v36_v0, %v39_v1 }
  0x9c   :  { %v42_v4 = vpop.permute.xlu0 %41 }
  0x9d   :  { %v50_v7 = vsel %vm49_vm1, %v48_v3, %v42_v4 }
  0x9e   :  { %v52_v8 = vsel %vm51_vm2, %v50_v7, %v45_v2 }
  0x9f   :  { %v55_v9 = vadd.f32 %v53_v5, %v52_v8  ;;  %v56_v10 = vadd.f32 %v54_v6, %v52_v8 }
  0xa1   :  { %57 = vst [vmem:[#allocation7] sm:$0xff] %v55_v9  ;;  %58 = vst [vmem:[#allocation7 + $0x8] sm:$0xff] %v56_v10 }
  0xa2   :  { %136 = shalt.err (!%p133_p6)
}
  0xa3   :  { %s137_s11 = scalar_lea.hbm %s212_s2, 256 }
  0xa4   :  { %p138_p7 = scmp.ne.s32.totalorder %s212_s2, %s137_s11  ;;  %p141_p8 = scmp.lt.u32.totalorder %s137_s11, %s212_s2 }
  0xa6   :  { %p143_p9 = pnand %p141_p8, %p138_p7 }
  0xa8   :  { %146 = shalt.err (!%p143_p9)
}
  0xa9   :  { %68 = dma.vmem_to_hbm [thread:$0]  %s66_s7, 256, %s212_s2, [#allocation4]  }
  0xaa   :  { %151 = dma.done.wait [#allocation4], 256  }
  0xab   :  { %152 = vsyncadd [#allocation4], 4294967040 }
  0xac   :  { %72 = vsyncpa [#allocation3], 1 }
  0xad   :  { %73 = vsyncpa [#allocation6], 1 }
  0xae   :  { %74 = vsyncpa [#allocation4], 1 }

</bundles_post_ra>
